<compile_context>
chip_gen: v7x
topology: tpu7x:2x2x1
jax: 0.10.0
libtpu: 0.0.40
codegen_flags: <defaults>
</compile_context>

<pallas_src>
import math
from functools import partial

import numpy as np
import jax
import jax.numpy as jnp
from jax.experimental import pallas as pl
from jax.experimental.pallas import tpu as pltpu


# ---------------------------------------------------------------------------
# Faithful port of DeepDecoderStruct (config logic only, numpy).
# ---------------------------------------------------------------------------
class DeepDecoderStruct:
    def __init__(self, deepdecoder_pars):
        self.K = [128] * 5 + [1]
        self.L, self.N, self.ND = (len(self.K) - 3, [512] * 2, 2)
        self.NCo, self.NRe, self.upsample_first = (None, None, True)
        self.use_sinc, self.use_act = (0, 0)
        self.use_conv_bn, self.use_bias = (0, False)
        self.der_input, self.Kred, self.use_bias_atac = (False, 1, False)
        self.P, self.use_dct = (self.N, True)
        if not isinstance(deepdecoder_pars, dict):
            deepdecoder_pars = deepdecoder_pars.__dict__
        for x in dir(self):
            if any(y == x for y in deepdecoder_pars):
                setattr(self, x, deepdecoder_pars[x])
        self.K = np.rint(np.array(self.K)).astype(int)
        self.L = np.rint(self.L).astype(int)
        if self.NCo is None:
            self.NCo = [1] * (self.L + 2)
        if self.NRe is None:
            self.NRe = [2] * self.L + [1] * 2
        self.NCo = np.rint(np.array(self.NCo)).astype(int)


# ---------------------------------------------------------------------------
# Fused Pallas kernel: chain of (1x1-conv matmul + activation) units per M-tile.
# Intermediate activations never touch HBM; weights stay resident in VMEM.
# ---------------------------------------------------------------------------
ACT_NONE, ACT_RELU, ACT_SIGMOID = 0, 1, 2


def _fused_units_kernel(*refs, acts):
    x_ref = refs[0]
    o_ref = refs[-1]
    w_refs = refs[1:-1]
    n = len(w_refs)

    h = x_ref[...]  # (tm, C0), compute dtype (bf16)
    for idx, (w_ref, act) in enumerate(zip(w_refs, acts)):
        y = jnp.dot(h, w_ref[...], preferred_element_type=jnp.float32)  # MXU, f32 acc
        if act == ACT_RELU:
            y = jnp.maximum(y, 0.0)
        elif act == ACT_SIGMOID:
            # exp -> EUP, reciprocal(approx) -> EUP; keeps the VALU slot free.
            y = pl.reciprocal(1.0 + jnp.exp(-y), approx=True)
        if idx + 1 < n:
            h = y.astype(w_refs[idx + 1].dtype)  # back to bf16 for the next MXU pass
        else:
            h = y
    o_ref[...] = h.astype(o_ref.dtype)


def _pick_tile_m(m, max_tile=2048):
    """Largest multiple-of-8 divisor of m (<= max_tile), preferring >=2 grid steps
    (so v7x's two TensorCores both get work).  Falls back to a single full block."""
    cands = [d for d in range(8, min(m, max_tile) + 1, 8) if m % d == 0]
    if not cands:
        return m
    multi = [d for d in cands if m // d >= 2]
    return max(multi) if multi else max(cands)


def fused_decoder_mlp(x2d, weights, acts, *, out_dtype=jnp.float32, max_tile=2048):
    """x2d: [M, C0] channels-last rows; weights: list of [Ci, Ci+1]; returns [M, C_last]."""
    M, C0 = x2d.shape
    C_last = weights[-1].shape[1]
    tm = _pick_tile_m(M, max_tile)
    grid = (M // tm,)  # exact: tm divides M, no padding needed

    in_specs = [pl.BlockSpec((tm, C0), lambda i: (i, 0))]
    for w in weights:
        ci, co = w.shape
        in_specs.append(pl.BlockSpec((ci, co), lambda i: (0, 0)))  # resident in VMEM
    out_specs = pl.BlockSpec((tm, C_last), lambda i: (i, 0))

    return pl.pallas_call(
        partial(_fused_units_kernel, acts=tuple(acts)),
        out_shape=jax.ShapeDtypeStruct((M, C_last), out_dtype),
        grid_spec=pltpu.PrefetchScalarGridSpec(
            num_scalar_prefetch=0,
            grid=grid,
            in_specs=in_specs,
            out_specs=out_specs,
        ),
        compiler_params=pltpu.CompilerParams(
            dimension_semantics=("parallel",)
        ),
    )(x2d, *weights)


# ---------------------------------------------------------------------------
# DeepDecoderNetwork forward (Pallas-backed).
# ---------------------------------------------------------------------------
class DeepDecoderNetworkPallas:
    def __init__(self, deep_decoder_struct=None, *, key=None,
                 compute_dtype=jnp.bfloat16):
        dds = DeepDecoderStruct(deep_decoder_struct)
        self.der_input = dds.der_input            # only toggles autograd in torch; no-op
        self.upsample_first = dds.upsample_first  # irrelevant for nearest + 1x1 conv (commute)
        self.compute_dtype = compute_dtype

        L = int(dds.L)
        keys = jax.random.split(key, L + 2)
        P = np.asarray(dds.P, dtype=np.float64)

        self.weights, self.acts = [], []
        fy_total, fx_total = 1, 1
        self.in_spatial = None
        for i in range(L + 2):
            use_act = dds.use_act
            if i == L + 1:
                use_act = 5
            nin = np.ceil(P / np.prod(dds.NRe[i:])).astype(int)
            nou = np.ceil(P / np.prod(dds.NRe[i + 1:])).astype(int)
            if i == 0:
                self.in_spatial = (int(nin[0]), int(nin[1]))
            cin, cout = int(dds.K[i]), int(dds.K[i + 1])
            # Deterministic weight init (1x1 conv, no bias: use_bias=False).
            w = jax.random.normal(keys[i], (cin, cout), jnp.float32) / math.sqrt(cin)
            self.weights.append(w.astype(compute_dtype))
            self.acts.append(ACT_RELU if use_act == 0 else ACT_NONE)
            fy_total *= int(nou[0]) // int(nin[0])
            fx_total *= int(nou[1]) // int(nin[1])
        # Trailing nn.Sigmoid() fused into the last unit inside the kernel.
        self.acts[-1] = ACT_SIGMOID
        self.fy_total, self.fx_total = fy_total, fx_total

    def __call__(self, x):
        # x: NCHW [B, K0, H0, W0].  Single layout change in, single layout change out.
        B, C0, H0, W0 = x.shape
        x2d = jnp.transpose(x, (0, 2, 3, 1)).reshape(B * H0 * W0, C0)
        x2d = x2d.astype(self.compute_dtype)

        out2d = fused_decoder_mlp(x2d, self.weights, self.acts)

        C_last = self.weights[-1].shape[1]
        y = out2d.reshape(B, H0, W0, C_last)
        # Single nearest-neighbor upsample of the (tiny, C_last-channel) result.
        if self.fy_total > 1:
            y = jnp.repeat(y, self.fy_total, axis=1)
        if self.fx_total > 1:
            y = jnp.repeat(y, self.fx_total, axis=2)
        return jnp.transpose(y, (0, 3, 1, 2))  # back to NCHW


# ---------------------------------------------------------------------------
if __name__ == "__main__":
    # Small config consistent with the module's parameterization:
    # K = [16]*5 + [1] -> 5 decoder units (16->16 x4, 16->1); NRe = [2,2,2,1,1],
    # P = [32,32] -> input spatial 4x4, output spatial 32x32.
    pars = dict(K=[16] * 5 + [1], N=[32, 32], P=[32, 32])

    key = jax.random.PRNGKey(0)
    k_net, k_in = jax.random.split(key)

    net = DeepDecoderNetworkPallas(pars, key=k_net)

    # Deep-decoder input: [B, K[0], nin0, nin0] = [2, 16, 4, 4]  (NCHW).
    x = jax.random.normal(k_in, (2, 16, 4, 4), jnp.float32)

    y = net(x)
    y = jax.block_until_ready(y)

    assert y.shape == (2, 1, 32, 32), y.shape
    # approx=True reciprocal can deviate by ~1e-3 around the saturation points.
    assert bool(jnp.all((y >= -1e-2) & (y <= 1.0 + 1e-2))), "sigmoid output out of range"
    print("KERNEL_OK")
</pallas_src>

<mosaic_0001>
module attributes {stable_mosaic.version = 11 : i64} {
  func.func @_fused_units_kernel(%arg0: i32, %arg1: memref<16x16xbf16, #tpu.memory_space<vmem>>, %arg2: memref<16x16xbf16, #tpu.memory_space<vmem>>, %arg3: memref<16x16xbf16, #tpu.memory_space<vmem>>, %arg4: memref<16x16xbf16, #tpu.memory_space<vmem>>, %arg5: memref<16x16xbf16, #tpu.memory_space<vmem>>, %arg6: memref<16x1xbf16, #tpu.memory_space<vmem>>, %arg7: memref<16x1xf32, #tpu.memory_space<vmem>>) attributes {dimension_semantics = [#tpu.dimension_semantics<parallel>], iteration_bounds = array<i64: 2>, scalar_prefetch = 0 : i64, scratch_operands = 0 : i64, tpu.core_type = #tpu.core_type<tc>, window_params = [{transform_indices = @transform_0, window_bounds = array<i64: 16, 16>}, {pipeline_mode = #tpu.pipeline_mode<synchronous>, transform_indices = @transform_1, window_bounds = array<i64: 16, 16>}, {pipeline_mode = #tpu.pipeline_mode<synchronous>, transform_indices = @transform_2, window_bounds = array<i64: 16, 16>}, {pipeline_mode = #tpu.pipeline_mode<synchronous>, transform_indices = @transform_3, window_bounds = array<i64: 16, 16>}, {pipeline_mode = #tpu.pipeline_mode<synchronous>, transform_indices = @transform_4, window_bounds = array<i64: 16, 16>}, {pipeline_mode = #tpu.pipeline_mode<synchronous>, transform_indices = @transform_5, window_bounds = array<i64: 16, 1>}, {transform_indices = @transform_6, window_bounds = array<i64: 16, 1>}]} {
    %c0 = arith.constant 0 : index
    %c0_0 = arith.constant 0 : index
    %0 = vector.load %arg1[%c0, %c0_0] : memref<16x16xbf16, #tpu.memory_space<vmem>>, vector<16x16xbf16>
    %c0_1 = arith.constant 0 : index
    %c0_2 = arith.constant 0 : index
    %1 = vector.load %arg2[%c0_1, %c0_2] : memref<16x16xbf16, #tpu.memory_space<vmem>>, vector<16x16xbf16>
    %cst = arith.constant dense<0.000000e+00> : vector<16x16xf32>
    %2 = tpu.matmul %0, %1, %cst {dimension_numbers = #tpu.dot_dimension_numbers<[1], [0], [0], [1], [0, 0, 1, 1], [], []>} : vector<16x16xbf16>, vector<16x16xbf16>, vector<16x16xf32> -> vector<16x16xf32>
    %cst_3 = arith.constant 0.000000e+00 : f32
    %3 = vector.broadcast %cst_3 : f32 to vector<16x16xf32>
    %4 = arith.maximumf %2, %3 : vector<16x16xf32>
    %5 = arith.truncf %4 : vector<16x16xf32> to vector<16x16xbf16>
    %c0_4 = arith.constant 0 : index
    %c0_5 = arith.constant 0 : index
    %6 = vector.load %arg3[%c0_4, %c0_5] : memref<16x16xbf16, #tpu.memory_space<vmem>>, vector<16x16xbf16>
    %cst_6 = arith.constant dense<0.000000e+00> : vector<16x16xf32>
    %7 = tpu.matmul %5, %6, %cst_6 {dimension_numbers = #tpu.dot_dimension_numbers<[1], [0], [0], [1], [0, 0, 1, 1], [], []>} : vector<16x16xbf16>, vector<16x16xbf16>, vector<16x16xf32> -> vector<16x16xf32>
    %cst_7 = arith.constant 0.000000e+00 : f32
    %8 = vector.broadcast %cst_7 : f32 to vector<16x16xf32>
    %9 = arith.maximumf %7, %8 : vector<16x16xf32>
    %10 = arith.truncf %9 : vector<16x16xf32> to vector<16x16xbf16>
    %c0_8 = arith.constant 0 : index
    %c0_9 = arith.constant 0 : index
    %11 = vector.load %arg4[%c0_8, %c0_9] : memref<16x16xbf16, #tpu.memory_space<vmem>>, vector<16x16xbf16>
    %cst_10 = arith.constant dense<0.000000e+00> : vector<16x16xf32>
    %12 = tpu.matmul %10, %11, %cst_10 {dimension_numbers = #tpu.dot_dimension_numbers<[1], [0], [0], [1], [0, 0, 1, 1], [], []>} : vector<16x16xbf16>, vector<16x16xbf16>, vector<16x16xf32> -> vector<16x16xf32>
    %cst_11 = arith.constant 0.000000e+00 : f32
    %13 = vector.broadcast %cst_11 : f32 to vector<16x16xf32>
    %14 = arith.maximumf %12, %13 : vector<16x16xf32>
    %15 = arith.truncf %14 : vector<16x16xf32> to vector<16x16xbf16>
    %c0_12 = arith.constant 0 : index
    %c0_13 = arith.constant 0 : index
    %16 = vector.load %arg5[%c0_12, %c0_13] : memref<16x16xbf16, #tpu.memory_space<vmem>>, vector<16x16xbf16>
    %cst_14 = arith.constant dense<0.000000e+00> : vector<16x16xf32>
    %17 = tpu.matmul %15, %16, %cst_14 {dimension_numbers = #tpu.dot_dimension_numbers<[1], [0], [0], [1], [0, 0, 1, 1], [], []>} : vector<16x16xbf16>, vector<16x16xbf16>, vector<16x16xf32> -> vector<16x16xf32>
    %cst_15 = arith.constant 0.000000e+00 : f32
    %18 = vector.broadcast %cst_15 : f32 to vector<16x16xf32>
    %19 = arith.maximumf %17, %18 : vector<16x16xf32>
    %20 = arith.truncf %19 : vector<16x16xf32> to vector<16x16xbf16>
    %c0_16 = arith.constant 0 : index
    %c0_17 = arith.constant 0 : index
    %21 = vector.load %arg6[%c0_16, %c0_17] : memref<16x1xbf16, #tpu.memory_space<vmem>>, vector<16x1xbf16>
    %cst_18 = arith.constant dense<0.000000e+00> : vector<16x1xf32>
    %22 = tpu.matmul %20, %21, %cst_18 {dimension_numbers = #tpu.dot_dimension_numbers<[1], [0], [0], [1], [0, 0, 1, 1], [], []>} : vector<16x16xbf16>, vector<16x1xbf16>, vector<16x1xf32> -> vector<16x1xf32>
    %cst_19 = arith.constant 0.000000e+00 : f32
    %23 = vector.broadcast %cst_19 : f32 to vector<16x1xf32>
    %24 = arith.subf %23, %22 : vector<16x1xf32>
    %25 = math.exp %24 : vector<16x1xf32>
    %cst_20 = arith.constant 1.000000e+00 : f32
    %26 = vector.broadcast %cst_20 : f32 to vector<16x1xf32>
    %27 = arith.addf %26, %25 : vector<16x1xf32>
    %28 = tpu.reciprocal %27 {approx = true} : vector<16x1xf32> -> vector<16x1xf32>
    %c0_21 = arith.constant 0 : index
    %c0_22 = arith.constant 0 : index
    %29 = vector.load %arg7[%c0_21, %c0_22] : memref<16x1xf32, #tpu.memory_space<vmem>>, vector<16x1xf32>
    tpu.vector_store %arg7[%c0_21, %c0_22], %28 {strides = array<i32>} : memref<16x1xf32, #tpu.memory_space<vmem>>, vector<16x1xf32>,
    return
  }
  func.func @transform_0(%arg0: i32) -> (i32, i32) {
    %c0_i32 = arith.constant 0 : i32
    %c0_i32_0 = arith.constant 0 : i32
    return %arg0, %c0_i32 : i32, i32
  }
  func.func @transform_1(%arg0: i32) -> (i32, i32) {
    %c0_i32 = arith.constant 0 : i32
    %c0_i32_0 = arith.constant 0 : i32
    %c0_i32_1 = arith.constant 0 : i32
    return %c0_i32, %c0_i32_0 : i32, i32
  }
  func.func @transform_2(%arg0: i32) -> (i32, i32) {
    %c0_i32 = arith.constant 0 : i32
    %c0_i32_0 = arith.constant 0 : i32
    %c0_i32_1 = arith.constant 0 : i32
    return %c0_i32, %c0_i32_0 : i32, i32
  }
  func.func @transform_3(%arg0: i32) -> (i32, i32) {
    %c0_i32 = arith.constant 0 : i32
    %c0_i32_0 = arith.constant 0 : i32
    %c0_i32_1 = arith.constant 0 : i32
    return %c0_i32, %c0_i32_0 : i32, i32
  }
  func.func @transform_4(%arg0: i32) -> (i32, i32) {
    %c0_i32 = arith.constant 0 : i32
    %c0_i32_0 = arith.constant 0 : i32
    %c0_i32_1 = arith.constant 0 : i32
    return %c0_i32, %c0_i32_0 : i32, i32
  }
  func.func @transform_5(%arg0: i32) -> (i32, i32) {
    %c0_i32 = arith.constant 0 : i32
    %c0_i32_0 = arith.constant 0 : i32
    %c0_i32_1 = arith.constant 0 : i32
    return %c0_i32, %c0_i32_0 : i32, i32
  }
  func.func @transform_6(%arg0: i32) -> (i32, i32) {
    %c0_i32 = arith.constant 0 : i32
    %c0_i32_0 = arith.constant 0 : i32
    return %arg0, %c0_i32 : i32, i32
  }
}

</mosaic_0001>

<bundles_post_ra>
// kernel: tpu_custom_call.1
= control target key start
LH: loop header
LB: loop body
LE: loop exit
PB: predicated region body
PF: predicated region fallthrough
CT: control target
= control target key end

     0   :  { %s736_s21 = smov 0   ;;  %s782_s0 = inlined_call_operand.vmem [shape: bf16[32,16], index: 0, kind: input, shape index: {}]   ;;  %s783_s1 = inlined_call_operand.vmem [shape: bf16[16,16], index: 1, kind: input, shape index: {}]   ;;  %s784_s2 = inlined_call_operand.vmem [shape: bf16[16,16], index: 2, kind: input, shape index: {}]   ;;  %s785_s3 = inlined_call_operand.vmem [shape: bf16[16,16], index: 3, kind: input, shape index: {}]   ;;  %s786_s4 = inlined_call_operand.vmem [shape: bf16[16,16], index: 4, kind: input, shape index: {}]   ;;  %s787_s5 = inlined_call_operand.vmem [shape: bf16[16,1], index: 5, kind: input, shape index: {}]   ;;  %s788_s6 = inlined_call_operand.vmem [shape: f32[32,1], index: 6, kind: output, shape index: {}]  }
   0x1 LB: > { %s605_s22 = sadd.s32 4294967295, %s697_s21   ;;  %p609_p0 = scmp.ge.s32.totalorder %s697_s21, 1  ;;  %s697_s21 = sphi %s736_s21, %s16_s21  }
   0x2   : > { %p213_p1 = scmp.lt.s32.totalorder %s697_s21, 3 }
   0x4   : > { %p214_p2 = pnand %p609_p0, %p213_p1 }
   0x5   : > { %v677_v0 = vld [vmem:[%s783_s1] sm:$0xff] (!%p214_p2)   ;;  %v699_v1 = vmov (!%p214_p2), 0.0   ;;  %s610_s25 = sshll.u32 (!%p214_p2), %s605_s22, 1  ;;  %vm700_vm0 = vmmov (!%p214_p2), 0   ;;  %vm271_vm1 = vcmask (!%p214_p2), 130048   ;;  %vm546_vm2 = vcmask (!%p214_p2), 7168  }
   0x6   : > { %217 = sbr.rel (%p214_p2) target bundleno = 1132 (0x46c), region = 44  ;;  %637 = vmatprep.subr.bf16.mxu0 (!%p214_p2), %v699_v1  ;;  %643 = vmatprep.subr.bf16.mxu1 (!%p214_p2), %v699_v1  ;;  %p244_p3 = scmp.lt.s32.totalorder (!%p214_p2), %s610_s25, 3  ;;  %v679_v3 = vld [vmem:[%s784_s2] sm:$0xff] (!%p214_p2)  }
   0x7   : > { %638 = vmatpush3.bf16.msra.mxu0 (!%p214_p2), %v677_v0  ;;  %639 = vmatprep.mubr.msk.bf16.mxu0 (!%p214_p2), %vm700_vm0, %v699_v1  ;;  %v680_v4 = vld [vmem:[%s785_s3] sm:$0xff] (!%p214_p2)  }
   0x8   : > { %645 = vmatprep.mubr.msk.bf16.mxu1 (!%p214_p2), %vm700_vm0, %v699_v1  ;;  %649 = vmatprep.subr.bf16.mxu0 (!%p214_p2), %v699_v1  ;;  %v681_v12 = vld [vmem:[%s786_s4] sm:$0xff] (!%p214_p2)  }
   0x9   : > { %644 = vmatpush3.bf16.msra.mxu1 (!%p214_p2), %v679_v3  ;;  %v682_v20 = vld [vmem:[%s787_s5] sm:$0xff] (!%p214_p2)  }
   0xa   : > { %655 = vmatprep.subr.bf16.mxu1 (!%p214_p2), %v699_v1 }
   0xd   : > { %s790_s25 = smov (!%p244_p3, %s610_s25), 3 }
   0xe   : > { %s611_s26 = sshll.u32 %s790_s25, 2  ;;  %s613_s14 = sshll.u32 %s790_s25, 3 }
   0xf   : > { %s247_s29 = scalar_lea.vmem %s782_s0, %s611_s26  ;;  %s253_s17 = scalar_lea.vmem %s788_s6, %s613_s14 }
  0x10   : > { %v678_v2 = vld [vmem:[%s247_s29] sm:$0xff]  }
  0x11   : > { %640 = vmatmul.mubr.msk.bf16.vlgmr.msra.gmra.mrb[0].mxu0 %vm271_vm1, %v678_v2 }
  0x12   : > { %651 = vmatprep.mubr.msk.bf16.mxu0 %vm700_vm0, %v699_v1  ;;  %650 = vmatpush3.bf16.msra.mxu0 %v680_v4 }
  0x13   : > { %661 = vmatprep.subr.bf16.mxu0 %v699_v1 }
  0xe4   : > { %v309_v5 = vpop.f32.mrb[0].mxu0 }
  0xe5   : > { %v641_v6 = vpop.f32.mrb[1].mxu0  ;;  %v316_v8 = vmax.f32 %v309_v5, 0.0 }
  0xe6   : > { %v312_v7 = vpop.f32.mrb[2].mxu0 }
  0xe7   : > { %v317_v9 = vmax.f32 %v312_v7, 0.0  ;;  %v642_v10 = vpop.f32.mrb[3].mxu0 }
  0xe9   : > { %v318_v11 = vpack.c.bf16 %v317_v9, %v316_v8 }
  0xeb   : > { %646 = vmatmul.mubr.msk.bf16.vlgmr.msra.gmra.mrb[0].mxu1 %vm271_vm1, %v318_v11 }
  0xec   : > { %657 = vmatprep.mubr.msk.bf16.mxu1 %vm700_vm0, %v699_v1  ;;  %656 = vmatpush3.bf16.msra.mxu1 %v681_v12 }
 0x1be   : > { %v364_v13 = vpop.f32.mrb[0].mxu1 }
 0x1bf   : > { %v647_v14 = vpop.f32.mrb[1].mxu1  ;;  %v371_v16 = vmax.f32 %v364_v13, 0.0 }
 0x1c0   : > { %v367_v15 = vpop.f32.mrb[2].mxu1 }
 0x1c1   : > { %v372_v17 = vmax.f32 %v367_v15, 0.0  ;;  %v648_v18 = vpop.f32.mrb[3].mxu1 }
 0x1c3   : > { %v373_v19 = vpack.c.bf16 %v372_v17, %v371_v16 }
 0x1c5   : > { %652 = vmatmul.mubr.msk.bf16.vlgmr.msra.gmra.mrb[4].mxu0 %vm271_vm1, %v373_v19 }
 0x1c6   : > { %663 = vmatprep.mubr.msk.bf16.mxu0 %vm700_vm0, %v699_v1  ;;  %662 = vmatpush3.bf16.msra.mxu0 %v682_v20 }
 0x298   : > { %v419_v21 = vpop.f32.mrb[4].mxu0 }
 0x299   : > { %v653_v22 = vpop.f32.mrb[5].mxu0  ;;  %v426_v24 = vmax.f32 %v419_v21, 0.0 }
 0x29a   : > { %v422_v23 = vpop.f32.mrb[6].mxu0 }
 0x29b   : > { %v427_v25 = vmax.f32 %v422_v23, 0.0  ;;  %v654_v26 = vpop.f32.mrb[7].mxu0 }
 0x29d   : > { %v428_v27 = vpack.c.bf16 %v427_v25, %v426_v24 }
 0x29f   : > { %658 = vmatmul.mubr.msk.bf16.vlgmr.msra.gmra.mrb[4].mxu1 %vm271_vm1, %v428_v27 }
 0x372   : > { %v474_v28 = vpop.f32.mrb[4].mxu1 }
 0x373   : > { %v659_v29 = vpop.f32.mrb[5].mxu1  ;;  %v481_v31 = vmax.f32 %v474_v28, 0.0 }
 0x374   : > { %v477_v30 = vpop.f32.mrb[6].mxu1 }
 0x375   : > { %v482_v32 = vmax.f32 %v477_v30, 0.0  ;;  %v660_v33 = vpop.f32.mrb[7].mxu1 }
 0x377   : > { %v483_v34 = vpack.c.bf16 %v482_v32, %v481_v31 }
 0x379   : > { %664 = vmatmul.mubr.msk.bf16.vlgmr.msra.gmra.mrb[8].mxu0 %vm271_vm1, %v483_v34 }
 0x44c   : > { %v529_v35 = vpop.f32.mrb[8].mxu0 }
 0x44d   : > { %v536_v36 = vsub.f32 0.0, %v529_v35  ;;  %v665_v37 = vpop.f32.mrb[9].mxu0 }
 0x44e   : > { %v532_v38 = vpop.f32.mrb[10].mxu0 }
 0x44f   : > { %v538_v39 = vmul.f32 1.442695, %v536_v36  ;;  %v537_v40 = vsub.f32 0.0, %v532_v38  ;;  %v666_v41 = vpop.f32.mrb[11].mxu0 }
 0x451   : > { %683 = vpow2.f32 %v538_v39  ;;  %v540_v42 = vmul.f32 1.442695, %v537_v40 }
 0x453   : > { %685 = vpow2.f32 %v540_v42 }
 0x45b   : > { %v684_v43 = vpop.eup %683 }
 0x45c   : > { %v542_v44 = vadd.f32 1.0, %v684_v43 }
 0x45d   : > { %v686_v45 = vpop.eup %685 }
 0x45e   : > { %687 = vrcp.f32 %v542_v44  ;;  %v543_v46 = vadd.f32 1.0, %v686_v45 }
 0x460   : > { %689 = vrcp.f32 %v543_v46 }
 0x468   : > { %v688_v47 = vpop.eup %687 }
 0x469   : > { %547 = vst.msk [vmem:[%s253_s17] sm:$0xff] %vm546_vm2, %v688_v47 }
 0x46a   : > { %v690_v48 = vpop.eup %689 }
 0x46b   : > { %548 = vst.msk [vmem:[%s253_s17 + $0x8] sm:$0xff] %vm546_vm2, %v690_v48 }
 0x46c PF: > { %s16_s21 = sadd.s32 1, %s697_s21  }
 0x46d   : > { %p13_p4 = scmp.ge.s32.totalorder %s16_s21, 4  }
 0x46f   :  { %15 = sbr.rel (!%p13_p4) target bundleno = 1 (0x1), region = 74 }

</bundles_post_ra>
